<compile_context>
chip_gen: v5e
topology: v5e:2x2
jax: 0.10.0
libtpu: 0.0.40
codegen_flags: <defaults>
</compile_context>

<pallas_src>
import functools

import jax
import jax.numpy as jnp
from jax.experimental import pallas as pl
from jax.experimental.pallas import tpu as pltpu

OUT_PAD = 8  # final logits (2) zero-padded to 8 lanes; sliced back in the wrapper


def _round_up(n, m):
    return ((n + m - 1) // m) * m


def phishing_net_kernel(
    x_ref,
    w1_ref, b1_ref,
    w2_ref, b2_ref,
    w3_ref, b3_ref,
    w4_ref, b4_ref,
    out_ref,
):
    # layer 1: fc1 (BN folded) -> relu          (dropout = identity in eval)
    h = jnp.dot(x_ref[...], w1_ref[...], preferred_element_type=jnp.float32)
    h = jnp.maximum(h + b1_ref[...], 0.0).astype(jnp.bfloat16)

    # layer 2: fc2 (BN folded) -> relu
    h = jnp.dot(h, w2_ref[...], preferred_element_type=jnp.float32)
    h = jnp.maximum(h + b2_ref[...], 0.0).astype(jnp.bfloat16)

    # layer 3: fc3 (BN folded) -> relu
    h = jnp.dot(h, w3_ref[...], preferred_element_type=jnp.float32)
    h = jnp.maximum(h + b3_ref[...], 0.0).astype(jnp.bfloat16)

    # layer 4: fc4 (zero-padded to OUT_PAD logit lanes)
    out = jnp.dot(h, w4_ref[...], preferred_element_type=jnp.float32) + b4_ref[...]
    out_ref[...] = out.astype(out_ref.dtype)


def fold_params(params):
    """Fold BN into the Linear layers (once), cast weights to bf16, pad fc4 to OUT_PAD."""
    def fold(w, b, scale, shift):
        w = (w * scale).astype(jnp.bfloat16)
        b = (b * scale + shift).astype(jnp.float32)
        return w, b

    w1, b1 = fold(params["w1"], params["b1"], params["bn1_scale"], params["bn1_shift"])
    w2, b2 = fold(params["w2"], params["b2"], params["bn2_scale"], params["bn2_shift"])
    w3, b3 = fold(params["w3"], params["b3"], params["bn3_scale"], params["bn3_shift"])

    w4 = jnp.zeros((32, OUT_PAD), jnp.float32).at[:, :2].set(params["w4"])
    w4 = w4.astype(jnp.bfloat16)
    b4 = jnp.zeros((1, OUT_PAD), jnp.float32).at[:, :2].set(params["b4"])

    return {"w1": w1, "b1": b1, "w2": w2, "b2": b2,
            "w3": w3, "b3": b3, "w4": w4, "b4": b4}


@functools.partial(jax.jit, static_argnames=("block_batch",))
def phishing_net_forward(x, folded, *, block_batch=2048):
    """x: [batch, input_dim] float32. folded: dict from fold_params (BN pre-folded)."""
    batch, input_dim = x.shape

    # Batch tile selection (static under jit):
    #  - large batch: `block_batch`-row tiles (amortizes per-step grid overhead)
    #  - mid batch:   split into >=2 tiles so both v7x TensorCores get work
    #  - small batch: one tight tile (min 8 rows)
    rb = _round_up(batch, 8)
    if rb > block_batch:
        tb = block_batch
    elif rb > 1024:
        tb = _round_up(pl.cdiv(rb, 2), 8)
    else:
        tb = rb
    padded_batch = _round_up(batch, tb)
    grid = (padded_batch // tb,)

    # bf16 matmul operands; batch-tail zero pad fused inside this jit.
    x_bf = x.astype(jnp.bfloat16)
    if padded_batch != batch:
        x_bf = jnp.pad(x_bf, ((0, padded_batch - batch), (0, 0)))

    weight_args = (
        folded["w1"], folded["b1"],
        folded["w2"], folded["b2"],
        folded["w3"], folded["b3"],
        folded["w4"], folded["b4"],
    )

    # x: batch-tiled (last dim == full array dim, no feature padding needed).
    in_specs = [pl.BlockSpec((tb, input_dim), lambda i: (i, 0))]
    # Weights / biases: one full-array block, VMEM-resident across the grid.
    for w in weight_args:
        in_specs.append(pl.BlockSpec(w.shape, lambda i: (0, 0)))

    out = pl.pallas_call(
        phishing_net_kernel,
        out_shape=jax.ShapeDtypeStruct((padded_batch, OUT_PAD), jnp.float32),
        grid=grid,
        in_specs=in_specs,
        out_specs=pl.BlockSpec((tb, OUT_PAD), lambda i: (i, 0)),
        compiler_params=pltpu.CompilerParams(
            dimension_semantics=("parallel",),
        ),
    )(x_bf, *weight_args)

    return out[:batch, :2]


def init_params(key, input_dim):
    """Deterministic synthetic parameters matching PhishingNet(input_dim)."""
    dims = [(input_dim, 128), (128, 64), (64, 32), (32, 2)]
    params = {}
    keys = jax.random.split(key, 4 * len(dims) + 4)
    ki = 0
    eps = 1e-5
    for li, (din, dout) in enumerate(dims, start=1):
        params[f"w{li}"] = (
            jax.random.normal(keys[ki], (din, dout), jnp.float32) * (1.0 / jnp.sqrt(din))
        )
        ki += 1
        params[f"b{li}"] = jax.random.normal(keys[ki], (1, dout), jnp.float32) * 0.01
        ki += 1
        if li <= 3:  # batch_norm1/2/3 (inference-mode fold)
            gamma = 1.0 + 0.1 * jax.random.normal(keys[ki], (1, dout), jnp.float32)
            ki += 1
            beta = 0.1 * jax.random.normal(keys[ki], (1, dout), jnp.float32)
            ki += 1
            run_mean = 0.05 * jax.random.normal(
                jax.random.fold_in(key, 100 + li), (1, dout), jnp.float32)
            run_var = 1.0 + 0.1 * jnp.abs(
                jax.random.normal(jax.random.fold_in(key, 200 + li), (1, dout), jnp.float32))
            scale = gamma / jnp.sqrt(run_var + eps)
            shift = beta - run_mean * scale
            params[f"bn{li}_scale"] = scale
            params[f"bn{li}_shift"] = shift
    return params


def reference_forward(x, params):
    """Plain-JAX f32 reference (unfolded) for correctness checking."""
    h = x @ params["w1"] + params["b1"]
    h = jnp.maximum(h * params["bn1_scale"] + params["bn1_shift"], 0.0)
    h = h @ params["w2"] + params["b2"]
    h = jnp.maximum(h * params["bn2_scale"] + params["bn2_shift"], 0.0)
    h = h @ params["w3"] + params["b3"]
    h = jnp.maximum(h * params["bn3_scale"] + params["bn3_shift"], 0.0)
    return h @ params["w4"] + params["b4"]


if __name__ == "__main__":
    key = jax.random.PRNGKey(0)
    batch, input_dim = 8, 30  # small, phishing-feature-like shapes

    kx, kp = jax.random.split(key)
    x = jax.random.normal(kx, (batch, input_dim), jnp.float32)
    params = init_params(kp, input_dim)
    folded = fold_params(params)  # fold once, reuse across calls

    out = phishing_net_forward(x, folded)
    out = jax.block_until_ready(out)

    ref = reference_forward(x, params)
    assert out.shape == (batch, 2)
    # bf16 matmul operands -> looser tolerance than the f32 reference
    assert jnp.allclose(out, ref, atol=1e-1, rtol=1e-1), "mismatch vs reference"

    # also exercise the gridded / multi-tile path (non-multiple batch tail)
    big_batch = 1000
    xb = jax.random.normal(jax.random.fold_in(key, 7), (big_batch, input_dim), jnp.float32)
    outb = jax.block_until_ready(phishing_net_forward(xb, folded, block_batch=256))
    refb = reference_forward(xb, params)
    assert outb.shape == (big_batch, 2)
    assert jnp.allclose(outb, refb, atol=1e-1, rtol=1e-1), "mismatch vs reference (batched)"

    print("KERNEL_OK")
</pallas_src>

<mosaic_0001>
module attributes {stable_mosaic.version = 11 : i64} {
  func.func @phishing_net_kernel(%arg0: i32, %arg1: memref<8x30xbf16, #tpu.memory_space<vmem>>, %arg2: memref<30x128xbf16, #tpu.memory_space<vmem>>, %arg3: memref<1x128xf32, #tpu.memory_space<vmem>>, %arg4: memref<128x64xbf16, #tpu.memory_space<vmem>>, %arg5: memref<1x64xf32, #tpu.memory_space<vmem>>, %arg6: memref<64x32xbf16, #tpu.memory_space<vmem>>, %arg7: memref<1x32xf32, #tpu.memory_space<vmem>>, %arg8: memref<32x8xbf16, #tpu.memory_space<vmem>>, %arg9: memref<1x8xf32, #tpu.memory_space<vmem>>, %arg10: memref<8x8xf32, #tpu.memory_space<vmem>>) attributes {dimension_semantics = [#tpu.dimension_semantics<parallel>], iteration_bounds = array<i64: 1>, scalar_prefetch = 0 : i64, scratch_operands = 0 : i64, tpu.core_type = #tpu.core_type<tc>, window_params = [{transform_indices = @transform_0, window_bounds = array<i64: 8, 30>}, {pipeline_mode = #tpu.pipeline_mode<synchronous>, transform_indices = @transform_1, window_bounds = array<i64: 30, 128>}, {pipeline_mode = #tpu.pipeline_mode<synchronous>, transform_indices = @transform_2, window_bounds = array<i64: 1, 128>}, {pipeline_mode = #tpu.pipeline_mode<synchronous>, transform_indices = @transform_3, window_bounds = array<i64: 128, 64>}, {pipeline_mode = #tpu.pipeline_mode<synchronous>, transform_indices = @transform_4, window_bounds = array<i64: 1, 64>}, {pipeline_mode = #tpu.pipeline_mode<synchronous>, transform_indices = @transform_5, window_bounds = array<i64: 64, 32>}, {pipeline_mode = #tpu.pipeline_mode<synchronous>, transform_indices = @transform_6, window_bounds = array<i64: 1, 32>}, {pipeline_mode = #tpu.pipeline_mode<synchronous>, transform_indices = @transform_7, window_bounds = array<i64: 32, 8>}, {pipeline_mode = #tpu.pipeline_mode<synchronous>, transform_indices = @transform_8, window_bounds = array<i64: 1, 8>}, {transform_indices = @transform_9, window_bounds = array<i64: 8, 8>}]} {
    %c0 = arith.constant 0 : index
    %c0_0 = arith.constant 0 : index
    %0 = vector.load %arg1[%c0, %c0_0] : memref<8x30xbf16, #tpu.memory_space<vmem>>, vector<8x30xbf16>
    %c0_1 = arith.constant 0 : index
    %c0_2 = arith.constant 0 : index
    %1 = vector.load %arg2[%c0_1, %c0_2] : memref<30x128xbf16, #tpu.memory_space<vmem>>, vector<30x128xbf16>
    %cst = arith.constant dense<0.000000e+00> : vector<8x128xf32>
    %2 = tpu.matmul %0, %1, %cst {dimension_numbers = #tpu.dot_dimension_numbers<[1], [0], [0], [1], [0, 0, 1, 1], [], []>} : vector<8x30xbf16>, vector<30x128xbf16>, vector<8x128xf32> -> vector<8x128xf32>
    %c0_3 = arith.constant 0 : index
    %c0_4 = arith.constant 0 : index
    %3 = vector.load %arg3[%c0_3, %c0_4] : memref<1x128xf32, #tpu.memory_space<vmem>>, vector<1x128xf32>
    %4 = vector.broadcast %3 : vector<1x128xf32> to vector<8x128xf32>
    %5 = arith.addf %2, %4 : vector<8x128xf32>
    %cst_5 = arith.constant 0.000000e+00 : f32
    %6 = vector.broadcast %cst_5 : f32 to vector<8x128xf32>
    %7 = arith.maximumf %5, %6 : vector<8x128xf32>
    %8 = arith.truncf %7 : vector<8x128xf32> to vector<8x128xbf16>
    %c0_6 = arith.constant 0 : index
    %c0_7 = arith.constant 0 : index
    %9 = vector.load %arg4[%c0_6, %c0_7] : memref<128x64xbf16, #tpu.memory_space<vmem>>, vector<128x64xbf16>
    %cst_8 = arith.constant dense<0.000000e+00> : vector<8x64xf32>
    %10 = tpu.matmul %8, %9, %cst_8 {dimension_numbers = #tpu.dot_dimension_numbers<[1], [0], [0], [1], [0, 0, 1, 1], [], []>} : vector<8x128xbf16>, vector<128x64xbf16>, vector<8x64xf32> -> vector<8x64xf32>
    %c0_9 = arith.constant 0 : index
    %c0_10 = arith.constant 0 : index
    %11 = vector.load %arg5[%c0_9, %c0_10] : memref<1x64xf32, #tpu.memory_space<vmem>>, vector<1x64xf32>
    %12 = vector.broadcast %11 : vector<1x64xf32> to vector<8x64xf32>
    %13 = arith.addf %10, %12 : vector<8x64xf32>
    %cst_11 = arith.constant 0.000000e+00 : f32
    %14 = vector.broadcast %cst_11 : f32 to vector<8x64xf32>
    %15 = arith.maximumf %13, %14 : vector<8x64xf32>
    %16 = arith.truncf %15 : vector<8x64xf32> to vector<8x64xbf16>
    %c0_12 = arith.constant 0 : index
    %c0_13 = arith.constant 0 : index
    %17 = vector.load %arg6[%c0_12, %c0_13] : memref<64x32xbf16, #tpu.memory_space<vmem>>, vector<64x32xbf16>
    %cst_14 = arith.constant dense<0.000000e+00> : vector<8x32xf32>
    %18 = tpu.matmul %16, %17, %cst_14 {dimension_numbers = #tpu.dot_dimension_numbers<[1], [0], [0], [1], [0, 0, 1, 1], [], []>} : vector<8x64xbf16>, vector<64x32xbf16>, vector<8x32xf32> -> vector<8x32xf32>
    %c0_15 = arith.constant 0 : index
    %c0_16 = arith.constant 0 : index
    %19 = vector.load %arg7[%c0_15, %c0_16] : memref<1x32xf32, #tpu.memory_space<vmem>>, vector<1x32xf32>
    %20 = vector.broadcast %19 : vector<1x32xf32> to vector<8x32xf32>
    %21 = arith.addf %18, %20 : vector<8x32xf32>
    %cst_17 = arith.constant 0.000000e+00 : f32
    %22 = vector.broadcast %cst_17 : f32 to vector<8x32xf32>
    %23 = arith.maximumf %21, %22 : vector<8x32xf32>
    %24 = arith.truncf %23 : vector<8x32xf32> to vector<8x32xbf16>
    %c0_18 = arith.constant 0 : index
    %c0_19 = arith.constant 0 : index
    %25 = vector.load %arg8[%c0_18, %c0_19] : memref<32x8xbf16, #tpu.memory_space<vmem>>, vector<32x8xbf16>
    %cst_20 = arith.constant dense<0.000000e+00> : vector<8x8xf32>
    %26 = tpu.matmul %24, %25, %cst_20 {dimension_numbers = #tpu.dot_dimension_numbers<[1], [0], [0], [1], [0, 0, 1, 1], [], []>} : vector<8x32xbf16>, vector<32x8xbf16>, vector<8x8xf32> -> vector<8x8xf32>
    %c0_21 = arith.constant 0 : index
    %c0_22 = arith.constant 0 : index
    %27 = vector.load %arg9[%c0_21, %c0_22] : memref<1x8xf32, #tpu.memory_space<vmem>>, vector<1x8xf32>
    %28 = vector.broadcast %27 : vector<1x8xf32> to vector<8x8xf32>
    %29 = arith.addf %26, %28 : vector<8x8xf32>
    %c0_23 = arith.constant 0 : index
    %c0_24 = arith.constant 0 : index
    %30 = vector.load %arg10[%c0_23, %c0_24] : memref<8x8xf32, #tpu.memory_space<vmem>>, vector<8x8xf32>
    tpu.vector_store %arg10[%c0_23, %c0_24], %29 {strides = array<i32>} : memref<8x8xf32, #tpu.memory_space<vmem>>, vector<8x8xf32>,
    return
  }
  func.func @transform_0(%arg0: i32) -> (i32, i32) {
    %c0_i32 = arith.constant 0 : i32
    %c0_i32_0 = arith.constant 0 : i32
    return %arg0, %c0_i32 : i32, i32
  }
  func.func @transform_1(%arg0: i32) -> (i32, i32) {
    %c0_i32 = arith.constant 0 : i32
    %c0_i32_0 = arith.constant 0 : i32
    %c0_i32_1 = arith.constant 0 : i32
    return %c0_i32, %c0_i32_0 : i32, i32
  }
  func.func @transform_2(%arg0: i32) -> (i32, i32) {
    %c0_i32 = arith.constant 0 : i32
    %c0_i32_0 = arith.constant 0 : i32
    %c0_i32_1 = arith.constant 0 : i32
    return %c0_i32, %c0_i32_0 : i32, i32
  }
  func.func @transform_3(%arg0: i32) -> (i32, i32) {
    %c0_i32 = arith.constant 0 : i32
    %c0_i32_0 = arith.constant 0 : i32
    %c0_i32_1 = arith.constant 0 : i32
    return %c0_i32, %c0_i32_0 : i32, i32
  }
  func.func @transform_4(%arg0: i32) -> (i32, i32) {
    %c0_i32 = arith.constant 0 : i32
    %c0_i32_0 = arith.constant 0 : i32
    %c0_i32_1 = arith.constant 0 : i32
    return %c0_i32, %c0_i32_0 : i32, i32
  }
  func.func @transform_5(%arg0: i32) -> (i32, i32) {
    %c0_i32 = arith.constant 0 : i32
    %c0_i32_0 = arith.constant 0 : i32
    %c0_i32_1 = arith.constant 0 : i32
    return %c0_i32, %c0_i32_0 : i32, i32
  }
  func.func @transform_6(%arg0: i32) -> (i32, i32) {
    %c0_i32 = arith.constant 0 : i32
    %c0_i32_0 = arith.constant 0 : i32
    %c0_i32_1 = arith.constant 0 : i32
    return %c0_i32, %c0_i32_0 : i32, i32
  }
  func.func @transform_7(%arg0: i32) -> (i32, i32) {
    %c0_i32 = arith.constant 0 : i32
    %c0_i32_0 = arith.constant 0 : i32
    %c0_i32_1 = arith.constant 0 : i32
    return %c0_i32, %c0_i32_0 : i32, i32
  }
  func.func @transform_8(%arg0: i32) -> (i32, i32) {
    %c0_i32 = arith.constant 0 : i32
    %c0_i32_0 = arith.constant 0 : i32
    %c0_i32_1 = arith.constant 0 : i32
    return %c0_i32, %c0_i32_0 : i32, i32
  }
  func.func @transform_9(%arg0: i32) -> (i32, i32) {
    %c0_i32 = arith.constant 0 : i32
    %c0_i32_0 = arith.constant 0 : i32
    return %arg0, %c0_i32 : i32, i32
  }
}

</mosaic_0001>

<bundles_post_ra>
// kernel: phishing_net_forward.1
= control target key start
LH: loop header
LB: loop body
LE: loop exit
PB: predicated region body
PF: predicated region fallthrough
CT: control target
= control target key end

     0   :  { %vm57_vm0 = vcmask 1046528   ;;  %vm53_vm1 = vcmask 244736   ;;  %vm195_vm2 = vcmask 523264   ;;  %vm234_vm3 = vcmask 261120   ;;  %s463_s1 = inlined_call_operand.vmem [shape: bf16[30,128], index: 1, kind: input, shape index: {}]   ;;  %s464_s3 = inlined_call_operand.vmem [shape: bf16[128,64], index: 3, kind: input, shape index: {}]   ;;  %s465_s2 = inlined_call_operand.vmem [shape: f32[1,128], index: 2, kind: input, shape index: {}]   ;;  %s466_s0 = inlined_call_operand.vmem [shape: bf16[8,30], index: 0, kind: input, shape index: {}]   ;;  %s467_s4 = inlined_call_operand.vmem [shape: f32[1,64], index: 4, kind: input, shape index: {}]   ;;  %s468_s5 = inlined_call_operand.vmem [shape: bf16[64,32], index: 5, kind: input, shape index: {}]   ;;  %s469_s6 = inlined_call_operand.vmem [shape: f32[1,32], index: 6, kind: input, shape index: {}]   ;;  %s470_s8 = inlined_call_operand.vmem [shape: f32[1,8], index: 8, kind: input, shape index: {}]   ;;  %s471_s7 = inlined_call_operand.vmem [shape: bf16[32,8], index: 7, kind: input, shape index: {}]   ;;  %s472_s9 = inlined_call_operand.vmem [shape: f32[8,8], index: 9, kind: output, shape index: {}]  }
   0x1   :  { %v263_v0 = vld [vmem:[%s463_s1 + $0x8] sm:$0xf]  ;;  %v325_v1 = vld [vmem:[%s463_s1 + $0x8] sm:$0x70]  ;;  %v333_v3 = vld [vmem:[%s464_s3 + $0x38] sm:$0xff]  ;;  %vm251_vm4 = vcmask 64512  }
   0x2   :  { %v264_v2 = vor.u32 %v325_v1, %v263_v0  ;;  %144 = vmatpush.bf16.msra.mxu1 %v333_v3  ;;  %v332_v5 = vld [vmem:[%s464_s3 + $0x30] sm:$0xff]  ;;  %v324_v6 = vld [vmem:[%s463_s1] sm:$0xff]  ;;  %v331_v7 = vld [vmem:[%s464_s3 + $0x28] sm:$0xff] }
   0x3   :  { %v33_v8 = vld [vmem:[%s466_s0] sm:$0xf]  ;;  %v329_v10 = vld [vmem:[%s464_s3 + $0x18] sm:$0xff]  ;;  %v328_v11 = vld [vmem:[%s464_s3 + $0x10] sm:$0xff] }
   0x4   :  { %v59_v4 = vsel %vm57_vm0, %v264_v2, 0  ;;  %v330_v9 = vld [vmem:[%s464_s3 + $0x20] sm:$0xff]  ;;  %v327_v12 = vld [vmem:[%s464_s3 + $0x8] sm:$0xff]  ;;  %v337_v14 = vld [vmem:[%s468_s5 + $0x18] sm:$0xff] }
   0x5   :  { %67 = vmatpush.bf16.msra.mxu0 %v59_v4  ;;  %v326_v13 = vld [vmem:[%s464_s3] sm:$0xff]  ;;  %203 = vmatpush.bf16.msra.mxu2 %v337_v14  ;;  %v336_v15 = vld [vmem:[%s468_s5 + $0x10] sm:$0xff]  ;;  %v335_v22 = vld [vmem:[%s468_s5 + $0x8] sm:$0xff] }
   0x6   :  { %145 = vmatpush.bf16.msra.mxu1 %v332_v5  ;;  %v340_v16 = vld [vmem:[%s465_s2] ss:$0 sm:$0xff]  ;;  %v339_v30 = vld [vmem:[%s471_s7 + $0x8] sm:$0xff] }
   0x7   :  { %v334_v23 = vld [vmem:[%s468_s5] sm:$0xff]  ;;  %244 = vmatpush.bf16.msra.mxu3 %v339_v30 }
   0x8   :  { %v341_v24 = vld [vmem:[%s467_s4] ss:$0 sm:$0xff] }
   0x9   :  { %68 = vmatpush.bf16.msra.mxu0 %v324_v6  ;;  %204 = vmatpush.bf16.msra.mxu2 %v336_v15  ;;  %v338_v31 = vld [vmem:[%s471_s7] sm:$0xff] }
   0xa   :  { %146 = vmatpush.bf16.msra.mxu1 %v331_v7  ;;  %v342_v32 = vld [vmem:[%s469_s6] ss:$0 sm:$0xff] }
   0xb   :  { %245 = vmatpush.bf16.msra.mxu3 %v338_v31  ;;  %v343_v38 = vld [vmem:[%s470_s8] ss:$0 sm:$0xff] }
   0xc   :  { %265 = vmatmul.msk.bf16.vlgmr.msra.gmra.mxu0 %vm53_vm1, %v33_v8 }
   0xd   :  { %205 = vmatpush.bf16.msra.mxu2 %v335_v22 }
   0xe   :  { %147 = vmatpush.bf16.msra.mxu1 %v330_v9 }
  0x11   :  { %206 = vmatpush.bf16.msra.mxu2 %v334_v23 }
  0x12   :  { %148 = vmatpush.bf16.msra.mxu1 %v329_v10 }
  0x16   :  { %149 = vmatpush.bf16.msra.mxu1 %v328_v11 }
  0x1a   :  { %150 = vmatpush.bf16.msra.mxu1 %v327_v12 }
  0x1e   :  { %151 = vmatpush.bf16.msra.mxu1 %v326_v13 }
  0x89   :  { %v70_v17 = vpop.f32.mrf.mxu0 }
  0x8a   :  { %v71_v18 = vadd.f32 %v340_v16, %v70_v17 }
  0x8c   :  { %v74_v19 = vmax.f32 %v71_v18, 0.0 }
  0x8e   :  { %v75_v20 = vpack.c.bf16 %v74_v19, %v74_v19 }
  0x90   :  { %152 = vmatmul.bf16.vlgmr.msra.gmra.mxu1 %v75_v20 }
  0x91   :  { %v72_v21 = vpop.f32.mrf.mxu0 }
 0x10d   :  { %v153_v25 = vpop.f32.mrf.mxu1 }
 0x10e   :  { %v154_v26 = vadd.f32 %v341_v24, %v153_v25 }
 0x110   :  { %v157_v27 = vmax.f32 %v154_v26, 0.0 }
 0x112   :  { %v158_v28 = vpack.c.bf16 %v157_v27, %v157_v27 }
 0x114   :  { %314 = vmatmul.msk.bf16.vlgmr.msra.gmra.mxu2 %vm195_vm2, %v158_v28 }
 0x115   :  { %v155_v29 = vpop.f32.mrf.mxu1 }
 0x197   :  { %v208_v33 = vpop.f32.mrf.mxu2 }
 0x198   :  { %v209_v34 = vadd.f32 %v342_v32, %v208_v33 }
 0x19a   :  { %v212_v35 = vmax.f32 %v209_v34, 0.0 }
 0x19c   :  { %v213_v36 = vpack.c.bf16 %v212_v35, %v212_v35 }
 0x19e   :  { %323 = vmatmul.msk.bf16.vlgmr.msra.gmra.mxu3 %vm234_vm3, %v213_v36 }
 0x19f   :  { %v210_v37 = vpop.f32.mrf.mxu2 }
 0x221   :  { %v247_v39 = vpop.f32.mrf.mxu3 }
 0x222   :  { %v248_v40 = vadd.f32 %v343_v38, %v247_v39 }
 0x224   :  { %252 = vst.msk [vmem:[%s472_s9] sm:$0xff] %vm251_vm4, %v248_v40 }
 0x229   :  { %v249_v41 = vpop.f32.mrf.mxu3 }

</bundles_post_ra>
